<compile_context>
chip_gen: v7x
topology: tpu7x:2x2x1
jax: 0.10.0
libtpu: 0.0.40
codegen_flags: <defaults>
</compile_context>

<pallas_src>
import jax
import jax.numpy as jnp
from jax.experimental import pallas as pl
from jax.experimental.pallas import tpu as pltpu


def _pair(v):
    return (v, v) if isinstance(v, int) else tuple(v)


def _round_up(x, m):
    return ((x + m - 1) // m) * m


def _sublane(dtype):
    # Packed-sublane granularity: 8 rows for 32-bit, 16 for 16-bit, 32 for 8-bit.
    return {4: 8, 2: 16, 1: 32}.get(jnp.dtype(dtype).itemsize, 8)


def _pad_dim(d):
    # No HBM padding for small dims (full-dim blocks are legal and avoid up to
    # 16x traffic amplification); 128-multiples for medium dims; 256-multiples
    # once the dim can feed the full 256x256 v6e/v7x MXU.
    if d < 128:
        return d
    if d < 256:
        return _round_up(d, 128)
    return _round_up(d, 256)


# ------------------------------- kernels -------------------------------------


def _gemm_kernel(a_ref, b_ref, o_ref):
    # Whole contraction resident: one MXU dot, f32 accumulation.
    o_ref[...] = jnp.dot(
        a_ref[...], b_ref[...], preferred_element_type=jnp.float32
    ).astype(o_ref.dtype)


def _gemm_acc_kernel(a_ref, b_ref, o_ref, acc_ref):
    # K tiled on the trailing ("arbitrary") grid axis: accumulate in f32 VMEM.
    @pl.when(pl.program_id(1) == 0)
    def _():
        acc_ref[...] = jnp.zeros_like(acc_ref)

    acc_ref[...] += jnp.dot(
        a_ref[...], b_ref[...], preferred_element_type=jnp.float32
    )

    @pl.when(pl.program_id(1) == pl.num_programs(1) - 1)
    def _():
        o_ref[...] = acc_ref[...].astype(o_ref.dtype)


# ------------------------------- wrapper --------------------------------------


def conv2d_pallas(x_nchw, w_fckk, stride=1, dilation=1, pad=0,
                  compute_dtype=jnp.bfloat16, block_m=128,
                  max_resident_k=512, vmem_budget_bytes=12 << 20):
    """Bias-free 2-D convolution matching torch.nn.Conv2d semantics (NCHW/OIHW)."""
    sh, sw = _pair(stride)
    dh, dw = _pair(dilation)
    ph, pw = _pair(pad)
    n, c, h, w = x_nchw.shape
    f, c2, kh, kw = w_fckk.shape
    assert c == c2, "channel mismatch"
    oh = (h + 2 * ph - dh * (kh - 1) - 1) // sh + 1
    ow = (w + 2 * pw - dw * (kw - 1) - 1) // sw + 1

    out_dtype = x_nchw.dtype
    compute_dtype = compute_dtype or out_dtype
    in_isz = jnp.dtype(compute_dtype).itemsize
    out_isz = jnp.dtype(out_dtype).itemsize

    k = kh * kw * c
    m = n * oh * ow
    kp = _pad_dim(k)
    fp = _pad_dim(f)

    # K tiling: whole contraction resident when small; otherwise a trailing
    # "arbitrary" grid axis with an f32 accumulator (kp is a 256-multiple then).
    if kp <= max_resident_k:
        block_k, grid_k = kp, 1
    else:
        block_k = 256
        grid_k = kp // block_k

    # M tiling: several blocks so both v7x TensorCores get pipelined steps;
    # fallback rounds to the packed-sublane granule of compute_dtype.
    granule = _sublane(compute_dtype)
    tm = block_m if m >= block_m else _round_up(m, granule)
    tm = _round_up(tm, granule)

    def _vmem_bytes(tm_):  # double-buffered A/B/out + optional f32 accumulator
        acc = tm_ * fp * 4 if grid_k > 1 else 0
        return (2 * tm_ * block_k * in_isz + 2 * block_k * fp * in_isz
                + 2 * tm_ * fp * out_isz + acc)

    while _vmem_bytes(tm) > vmem_budget_bytes and tm > granule:
        tm = max(granule, _round_up(tm // 2, granule))

    mp = _round_up(m, tm)
    grid_m = mp // tm

    # -------- glue: layout + im2col tap extraction (pure data movement) ------
    x_nhwc = jnp.transpose(x_nchw, (0, 2, 3, 1)).astype(compute_dtype)
    x_padded = jnp.pad(x_nhwc, ((0, 0), (ph, ph), (pw, pw), (0, 0)))

    taps = []
    for i in range(kh):
        for j in range(kw):
            r0, c0 = i * dh, j * dw
            taps.append(jax.lax.slice(
                x_padded,
                (0, r0, c0, 0),
                (n, r0 + (oh - 1) * sh + 1, c0 + (ow - 1) * sw + 1, c),
                (1, sh, sw, 1)))                                   # (N,OH,OW,C)
    patches = jnp.concatenate(taps, axis=-1)                       # (N,OH,OW,K)
    a = patches.reshape(m, k)
    a = jnp.pad(a, ((0, mp - m), (0, kp - k)))                     # (MP, KP)

    # Weights to MXU RHS layout (K, F); K order (kh, kw, c) matches the taps.
    b = jnp.transpose(w_fckk, (2, 3, 1, 0)).reshape(k, f).astype(compute_dtype)
    b = jnp.pad(b, ((0, kp - k), (0, fp - f)))                     # (KP, FP)

    cost = pl.CostEstimate(
        flops=2 * mp * kp * fp,
        transcendentals=0,
        bytes_accessed=mp * kp * in_isz + kp * fp * in_isz + mp * fp * out_isz)

    if grid_k == 1:
        kernel = _gemm_kernel
        grid_spec = pltpu.PrefetchScalarGridSpec(
            num_scalar_prefetch=0,
            grid=(grid_m,),
            in_specs=[pl.BlockSpec((tm, kp), lambda i: (i, 0)),   # A row block
                      pl.BlockSpec((kp, fp), lambda i: (0, 0))],  # B resident
            out_specs=pl.BlockSpec((tm, fp), lambda i: (i, 0)))
        dims = ("parallel",)
    else:
        kernel = _gemm_acc_kernel
        grid_spec = pltpu.PrefetchScalarGridSpec(
            num_scalar_prefetch=0,
            grid=(grid_m, grid_k),
            in_specs=[pl.BlockSpec((tm, block_k), lambda i, kk: (i, kk)),
                      pl.BlockSpec((block_k, fp), lambda i, kk: (kk, 0))],
            out_specs=pl.BlockSpec((tm, fp), lambda i, kk: (i, 0)),
            scratch_shapes=[pltpu.VMEM((tm, fp), jnp.float32)])
        dims = ("parallel", "arbitrary")

    out_padded = pl.pallas_call(
        kernel,
        out_shape=jax.ShapeDtypeStruct((mp, fp), out_dtype),
        grid_spec=grid_spec,
        compiler_params=pltpu.CompilerParams(
            dimension_semantics=dims,
            # Allow XLA to fuse the im2col pad/reshape producer of A into the
            # pallas input DMA (no extra HBM round trip for the A slab).
            allow_input_fusion=[True, False]),
        cost_estimate=cost,
    )(a, b)

    # -------- glue: undo padding / layout back to NCHW ------------------------
    out = out_padded[:m, :f].reshape(n, oh, ow, f)
    return jnp.transpose(out, (0, 3, 1, 2)).astype(out_dtype)


def _reference(x, weight, stride, dilation, pad):
    return jax.lax.conv_general_dilated(
        x, weight,
        window_strides=_pair(stride),
        padding=tuple((p, p) for p in _pair(pad)),
        rhs_dilation=_pair(dilation),
        dimension_numbers=("NCHW", "OIHW", "NCHW"))


if __name__ == "__main__":
    key0, key1 = jax.random.split(jax.random.PRNGKey(0))

    def make_inputs(key, n, c, h, w, f, kh, kw):
        kx, kw_ = jax.random.split(key)
        x = jax.random.normal(kx, (n, c, h, w), dtype=jnp.float32)
        bound = 1.0 / ((c * kh * kw) ** 0.5)   # Conv2d default init, no bias
        weight = jax.random.uniform(kw_, (f, c, kh, kw), dtype=jnp.float32,
                                    minval=-bound, maxval=bound)
        return x, weight

    # --- base config: Conv(c=4, f=8, kh=3, kw=3, stride=1, dilation=1, pad=1)
    x, weight = make_inputs(key0, 2, 4, 16, 16, 8, 3, 3)
    ref = _reference(x, weight, 1, 1, 1)

    out = jax.block_until_ready(conv2d_pallas(x, weight, stride=1, dilation=1,
                                              pad=1))              # bf16 path
    assert out.shape == ref.shape, (out.shape, ref.shape)
    assert jnp.allclose(out, ref, atol=5e-2, rtol=5e-2), "mismatch (bf16)"

    out32 = jax.block_until_ready(conv2d_pallas(x, weight, stride=1, dilation=1,
                                                pad=1,
                                                compute_dtype=jnp.float32))
    assert jnp.allclose(out32, ref, atol=1e-4, rtol=1e-4), "mismatch (f32)"

    # --- strided + dilated config --------------------------------------------
    out_s = jax.block_until_ready(conv2d_pallas(x, weight, stride=2, dilation=2,
                                                pad=2))
    ref_s = _reference(x, weight, 2, 2, 2)
    assert out_s.shape == ref_s.shape, (out_s.shape, ref_s.shape)
    assert jnp.allclose(out_s, ref_s, atol=5e-2, rtol=5e-2), \
        "mismatch (strided/dilated)"

    # --- larger config exercising the K-tiled accumulator path + 256-wide F --
    x2, w2 = make_inputs(key1, 2, 64, 16, 16, 256, 3, 3)   # K=576 -> 3 K-tiles
    out2 = jax.block_until_ready(conv2d_pallas(x2, w2, stride=1, dilation=1,
                                               pad=1))
    ref2 = _reference(x2, w2, 1, 1, 1)
    assert out2.shape == ref2.shape, (out2.shape, ref2.shape)
    assert jnp.allclose(out2, ref2, atol=5e-2, rtol=5e-2), "mismatch (K-tiled)"

    print("KERNEL_OK")
</pallas_src>

<mosaic_0001>
module attributes {stable_mosaic.version = 11 : i64} {
  func.func @_gemm_kernel(%arg0: i32, %arg1: memref<128x36xbf16, #tpu.memory_space<vmem>>, %arg2: memref<36x8xbf16, #tpu.memory_space<vmem>>, %arg3: memref<128x8xf32, #tpu.memory_space<vmem>>) attributes {dimension_semantics = [#tpu.dimension_semantics<parallel>], iteration_bounds = array<i64: 4>, scalar_prefetch = 0 : i64, scratch_operands = 0 : i64, tpu.core_type = #tpu.core_type<tc>, window_params = [{transform_indices = @transform_0, window_bounds = array<i64: 128, 36>}, {pipeline_mode = #tpu.pipeline_mode<synchronous>, transform_indices = @transform_1, window_bounds = array<i64: 36, 8>}, {transform_indices = @transform_2, window_bounds = array<i64: 128, 8>}]} {
    %c0 = arith.constant 0 : index
    %c0_0 = arith.constant 0 : index
    %0 = vector.load %arg1[%c0, %c0_0] : memref<128x36xbf16, #tpu.memory_space<vmem>>, vector<128x36xbf16>
    %c0_1 = arith.constant 0 : index
    %c0_2 = arith.constant 0 : index
    %1 = vector.load %arg2[%c0_1, %c0_2] : memref<36x8xbf16, #tpu.memory_space<vmem>>, vector<36x8xbf16>
    %cst = arith.constant dense<0.000000e+00> : vector<128x8xf32>
    %2 = tpu.matmul %0, %1, %cst {dimension_numbers = #tpu.dot_dimension_numbers<[1], [0], [0], [1], [0, 0, 1, 1], [], []>} : vector<128x36xbf16>, vector<36x8xbf16>, vector<128x8xf32> -> vector<128x8xf32>
    %c0_3 = arith.constant 0 : index
    %c0_4 = arith.constant 0 : index
    %3 = vector.load %arg3[%c0_3, %c0_4] : memref<128x8xf32, #tpu.memory_space<vmem>>, vector<128x8xf32>
    tpu.vector_store %arg3[%c0_3, %c0_4], %2 {strides = array<i32>} : memref<128x8xf32, #tpu.memory_space<vmem>>, vector<128x8xf32>,
    return
  }
  func.func @transform_0(%arg0: i32) -> (i32, i32) {
    %c0_i32 = arith.constant 0 : i32
    %c0_i32_0 = arith.constant 0 : i32
    return %arg0, %c0_i32 : i32, i32
  }
  func.func @transform_1(%arg0: i32) -> (i32, i32) {
    %c0_i32 = arith.constant 0 : i32
    %c0_i32_0 = arith.constant 0 : i32
    %c0_i32_1 = arith.constant 0 : i32
    return %c0_i32, %c0_i32_0 : i32, i32
  }
  func.func @transform_2(%arg0: i32) -> (i32, i32) {
    %c0_i32 = arith.constant 0 : i32
    %c0_i32_0 = arith.constant 0 : i32
    return %arg0, %c0_i32 : i32, i32
  }
}

</mosaic_0001>

<bundles_post_ra>
// kernel: tpu_custom_call.1
= control target key start
LH: loop header
LB: loop body
LE: loop exit
PB: predicated region body
PF: predicated region fallthrough
CT: control target
= control target key end

     0   :  { %s536_s9 = smov 0   ;;  %s608_s0 = inlined_call_operand.vmem [shape: bf16[512,36], index: 0, kind: input, shape index: {}]   ;;  %s609_s1 = inlined_call_operand.vmem [shape: bf16[36,8], index: 1, kind: input, shape index: {}]   ;;  %s610_s2 = inlined_call_operand.vmem [shape: f32[512,8], index: 2, kind: output, shape index: {}]  }
   0x1 LB: > { %s423_s10 = sadd.s32 4294967295, %s519_s9   ;;  %p427_p0 = scmp.ge.s32.totalorder %s519_s9, 1  ;;  %s519_s9 = sphi %s536_s9, %s12_s9  }
   0x2   : > { %p113_p1 = scmp.lt.s32.totalorder %s519_s9, 5 }
   0x4   : > { %p114_p2 = pnand %p427_p0, %p113_p1 }
   0x5   : > { %v502_v0 = vld [vmem:[%s609_s1] sm:$0xff] (!%p114_p2)   ;;  %v503_v1 = vld [vmem:[%s609_s1 + $0x8] sm:$0xff] (!%p114_p2)   ;;  %s428_s15 = sshll.u32 (!%p114_p2), %s423_s10, 4  ;;  %v504_v2 = vld [vmem:[%s609_s1 + $0x10] ss:$0 sps:$4 sm:$0x33] (!%p114_p2)  }
   0x6   : > { %117 = sbr.rel (%p114_p2) target bundleno = 243 (0xf3), region = 28  ;;  %464 = vmatprep.subr.bf16.mxu0 (!%p114_p2), %v502_v0  ;;  %486 = vmatprep.subr.bf16.mxu1 (!%p114_p2), %v502_v0  ;;  %p136_p3 = scmp.lt.s32.totalorder (!%p114_p2), %s428_s15, 63  ;;  %vm249_vm0 = vcmask (!%p114_p2), 1041408   ;;  %vm224_vm1 = vcmask (!%p114_p2), 293888   ;;  %vm350_vm2 = vcmask (!%p114_p2), 64512  }
   0x7   : > { %465 = vmatpush3.bf16.msra.mxu0 (!%p114_p2), %v502_v0  ;;  %489 = vmatpush3.bf16.msra.mxu1 (!%p114_p2), %v502_v0  ;;  %v251_v3 = vsel (!%p114_p2), %vm249_vm0, %v504_v2, 0 }
   0x8   : > { %466 = vmatprep.subr.bf16.mxu0 (!%p114_p2), %v503_v1  ;;  %487 = vmatprep.subr.bf16.mxu1 (!%p114_p2), %v503_v1 }
   0xb   : > { %467 = vmatpush3.bf16.msra.mxu0 (!%p114_p2), %v503_v1  ;;  %490 = vmatpush3.bf16.msra.mxu1 (!%p114_p2), %v503_v1 }
   0xc   : > { %492 = vmatprep.subr.msk.bf16.mxu0 (!%p114_p2), %vm249_vm0, %v504_v2  ;;  %493 = vmatprep.subr.msk.bf16.mxu1 (!%p114_p2), %vm249_vm0, %v504_v2 }
   0xd   : > { %s612_s15 = smov (!%p136_p3, %s428_s15), 63 }
   0xe   : > { %s429_s18 = sshll.u32 %s612_s15, 2  ;;  %s431_s22 = sshll.u32 %s612_s15, 3 }
   0xf   : > { %s139_s21 = scalar_lea.vmem %s608_s0, %s429_s18  ;;  %469 = vmatpush3.bf16.msra.mxu0 %v251_v3  ;;  %491 = vmatpush3.bf16.msra.mxu1 %v251_v3  ;;  %s571_s25 = scalar_lea.vmem %s610_s2, %s431_s22 }
  0x10   : > { %v505_v4 = vld [vmem:[%s139_s21] sm:$0xff]   ;;  %v507_v6 = vld [vmem:[%s139_s21 + $0x8] sm:$0xff]   ;;  %v509_v8 = vld [vmem:[%s139_s21 + $0x10] sm:$0xff]  }
  0x11   : > { %v506_v5 = vld [vmem:[%s139_s21 + $0x20] sm:$0xff]   ;;  %470 = vmatprep.mubr.msk.bf16.mxu0 %vm224_vm1, %v505_v4  ;;  %v508_v7 = vld [vmem:[%s139_s21 + $0x28] sm:$0xff]   ;;  %v510_v9 = vld [vmem:[%s139_s21 + $0x30] sm:$0xff]  }
  0x12   : > { %478 = vmatprep.mubr.msk.bf16.mxu1 %vm224_vm1, %v506_v5  ;;  %471 = vmatmul.mubr.msk.bf16.vlgmr.msra.gmra.mrb[0].mxu0 %vm224_vm1, %v507_v6  ;;  %v511_v10 = vld [vmem:[%s139_s21 + $0x18] sm:$0xff]  }
  0x13   : > { %479 = vmatmul.mubr.msk.bf16.vlgmr.msra.gmra.mrb[0].mxu1 %vm224_vm1, %v508_v7  ;;  %474 = vmatprep.mubr.msk.bf16.mxu0 %vm224_vm1, %v509_v8  ;;  %v512_v11 = vld [vmem:[%s139_s21 + $0x38] sm:$0xff]  }
  0x14   : > { %482 = vmatprep.mubr.msk.bf16.mxu1 %vm224_vm1, %v510_v9 }
  0x1a   : > { %475 = vmatmul.mubr.msk.bf16.gmra.mrb[4].mxu0 %vm224_vm1, %v511_v10 }
  0x1b   : > { %483 = vmatmul.mubr.msk.bf16.gmra.mrb[4].mxu1 %vm224_vm1, %v512_v11 }
  0xe5   : > { %v472_v12 = vpop.f32.mrb[0].mxu0 }
  0xe6   : > { %v480_v13 = vpop.f32.mrb[0].mxu1  ;;  %353 = vst.msk [vmem:[%s571_s25 + $0x10] sm:$0xff] %vm350_vm2, %v472_v12  ;;  %v287_v14 = vpop.f32.mrb[1].mxu0 }
  0xe7   : > { %361 = vst.msk [vmem:[%s571_s25 + $0x50] sm:$0xff] %vm350_vm2, %v480_v13  ;;  %v319_v15 = vpop.f32.mrb[1].mxu1  ;;  %351 = vst.msk [vmem:[%s571_s25] sm:$0xff] %vm350_vm2, %v287_v14  ;;  %v473_v16 = vpop.f32.mrb[2].mxu0 }
  0xe8   : > { %359 = vst.msk [vmem:[%s571_s25 + $0x40] sm:$0xff] %vm350_vm2, %v319_v15  ;;  %v481_v17 = vpop.f32.mrb[2].mxu1  ;;  %354 = vst.msk [vmem:[%s571_s25 + $0x18] sm:$0xff] %vm350_vm2, %v473_v16  ;;  %v290_v18 = vpop.f32.mrb[3].mxu0 }
  0xe9   : > { %362 = vst.msk [vmem:[%s571_s25 + $0x58] sm:$0xff] %vm350_vm2, %v481_v17  ;;  %v322_v19 = vpop.f32.mrb[3].mxu1  ;;  %352 = vst.msk [vmem:[%s571_s25 + $0x8] sm:$0xff] %vm350_vm2, %v290_v18 }
  0xea   : > { %360 = vst.msk [vmem:[%s571_s25 + $0x48] sm:$0xff] %vm350_vm2, %v322_v19 }
  0xed   : > { %v476_v20 = vpop.f32.mrb[4].mxu0 }
  0xee   : > { %v484_v21 = vpop.f32.mrb[4].mxu1  ;;  %357 = vst.msk [vmem:[%s571_s25 + $0x30] sm:$0xff] %vm350_vm2, %v476_v20  ;;  %v303_v22 = vpop.f32.mrb[5].mxu0 }
  0xef   : > { %365 = vst.msk [vmem:[%s571_s25 + $0x70] sm:$0xff] %vm350_vm2, %v484_v21  ;;  %v335_v23 = vpop.f32.mrb[5].mxu1  ;;  %355 = vst.msk [vmem:[%s571_s25 + $0x20] sm:$0xff] %vm350_vm2, %v303_v22  ;;  %v477_v24 = vpop.f32.mrb[6].mxu0 }
  0xf0   : > { %363 = vst.msk [vmem:[%s571_s25 + $0x60] sm:$0xff] %vm350_vm2, %v335_v23  ;;  %v485_v25 = vpop.f32.mrb[6].mxu1  ;;  %358 = vst.msk [vmem:[%s571_s25 + $0x38] sm:$0xff] %vm350_vm2, %v477_v24  ;;  %v306_v26 = vpop.f32.mrb[7].mxu0 }
  0xf1   : > { %366 = vst.msk [vmem:[%s571_s25 + $0x78] sm:$0xff] %vm350_vm2, %v485_v25  ;;  %v338_v27 = vpop.f32.mrb[7].mxu1  ;;  %356 = vst.msk [vmem:[%s571_s25 + $0x28] sm:$0xff] %vm350_vm2, %v306_v26 }
  0xf2   : > { %364 = vst.msk [vmem:[%s571_s25 + $0x68] sm:$0xff] %vm350_vm2, %v338_v27 }
  0xf3 PF: > { %s12_s9 = sadd.s32 1, %s519_s9  }
  0xf4   : > { %p9_p4 = scmp.ge.s32.totalorder %s12_s9, 6  }
  0xf6   :  { %11 = sbr.rel (!%p9_p4) target bundleno = 1 (0x1), region = 58 }

</bundles_post_ra>
